<compile_context>
chip_gen: v6e
topology: v6e:2x2x1
jax: 0.10.0
libtpu: 0.0.40
codegen_flags: <defaults>
</compile_context>

<pallas_src>
import functools

import jax
import jax.numpy as jnp
from jax.experimental import pallas as pl
from jax.experimental.pallas import tpu as pltpu


def _round_up(x, m):
    return (x + m - 1) // m * m


def _mae_kernel(y_pred_ref, y_true_ref, lens_ref, out_ref, acc_ref, *,
                seq_len, s_ragged):
    """One (BT, ST) tile. Grid = (batch tiles, seq tiles); seq axis reduces."""
    k = pl.program_id(1)

    @pl.when(k == 0)
    def _():
        acc_ref[...] = jnp.zeros_like(acc_ref)

    yp = y_pred_ref[...].astype(jnp.float32)             # (BT, ST)
    yt = y_true_ref[...].astype(jnp.float32)             # (BT, ST)
    lens = lens_ref[...]                                  # (BT, 1) int32

    bt, st = yp.shape
    # Local lane index 0..ST-1; thresholds are shifted per-tile instead of
    # adding k*ST to every element (saves one full-tile VALU op).
    col = jax.lax.broadcasted_iota(jnp.int32, (bt, st), 1)

    diff = yp - yt
    if s_ragged:
        # Columns >= S of the ragged edge block hold undefined data; they must
        # be zeroed with a where-select (0 * garbage could be NaN).  Static
        # branch: compiled in only when S % ST != 0.
        diff = jnp.where(col < (seq_len - k * st), diff, 0.0)

    # User-specified padding (cols in [seq_lens, S)) keeps the PyTorch
    # mask-multiply form so NaNs in masked-out positions still propagate.
    mask = (col < (lens - k * st)).astype(jnp.float32)    # (BT, ST)
    contrib = jnp.abs(mask * diff)                        # (BT, ST)

    # Lane-dense accumulation: fold ST lanes into 128-lane groups with plain
    # VALU adds; the single cross-lane reduce happens only at finalize.
    acc = acc_ref[...]
    for c in range(st // 128):                            # static, unrolled
        acc = acc + contrib[:, c * 128:(c + 1) * 128]
    acc_ref[...] = acc

    @pl.when(k == pl.num_programs(1) - 1)
    def _():
        row_sum = jnp.sum(acc_ref[...], axis=1, keepdims=True)   # (BT, 1)
        # Denominator straight from seq_lens (== sum of the mask row).
        den = jnp.minimum(lens, seq_len).astype(jnp.float32)     # (BT, 1)
        out_ref[...] = row_sum / den


@functools.partial(jax.jit, static_argnames=("block_b", "block_s"))
def _mae_loss_call(y_pred, y_true, seq_lens, block_b, block_s):
    B, S = y_pred.shape

    # Tile selection: lane-dense, multiples of (8, 128), capped at (256, 2048)
    # -> 2 inputs x 2 buffers x 256x2048x4B = 8 MiB, under the 16 MiB default
    # scoped-VMEM limit on v5e and comfortably inside v6e/v7x budgets.
    bt = block_b if block_b is not None else min(256, _round_up(B, 8))
    st = block_s if block_s is not None else min(2048, _round_up(S, 128))
    bt = _round_up(max(bt, 8), 8)
    st = _round_up(max(st, 128), 128)

    # v7x megacore: ensure the "parallel" batch axis has >= 2 tiles so the
    # grid shards across both TensorCores (harmless on single-TC chips).
    if block_b is None and pl.cdiv(B, bt) == 1 and B > 8:
        bt = _round_up(pl.cdiv(B, 2), 8)

    b_tiles = pl.cdiv(B, bt)
    s_tiles = pl.cdiv(S, st)
    b_pad = b_tiles * bt

    # No padding of the big inputs (no extra HBM copies).  Only the tiny (B,)
    # seq_lens vector is padded so every lens block is full; padded rows get
    # lens = S (finite MAE) and are discarded on the ragged output writeback.
    lens = jnp.pad(seq_lens.astype(jnp.int32), (0, b_pad - B),
                   constant_values=S).reshape(b_pad, 1)

    itemsize = jnp.dtype(y_pred.dtype).itemsize
    cost = pl.CostEstimate(
        flops=5 * B * S,
        transcendentals=0,
        bytes_accessed=2 * B * S * itemsize + b_pad * 4 + B * 4,
    )

    kernel = functools.partial(_mae_kernel, seq_len=S, s_ragged=(S % st != 0))
    per_row = pl.pallas_call(
        kernel,
        out_shape=jax.ShapeDtypeStruct((B, 1), jnp.float32),
        grid_spec=pltpu.PrefetchScalarGridSpec(
            num_scalar_prefetch=0,
            grid=(b_tiles, s_tiles),
            in_specs=[
                pl.BlockSpec((bt, st), lambda i, k: (i, k)),
                pl.BlockSpec((bt, st), lambda i, k: (i, k)),
                pl.BlockSpec((bt, 1), lambda i, k: (i, 0)),
            ],
            out_specs=pl.BlockSpec((bt, 1), lambda i, k: (i, 0)),
            scratch_shapes=[pltpu.VMEM((bt, 128), jnp.float32)],
        ),
        compiler_params=pltpu.CompilerParams(
            dimension_semantics=("parallel", "arbitrary")),
        cost_estimate=cost,
    )(y_pred, y_true, lens)

    # PyTorch: mean(dim=0) over the (B, 1) per-row MAE -> shape (1,), f32.
    return jnp.mean(per_row, axis=0)


def mae_loss(y_pred, y_true, seq_lens=None, *, block_b=None, block_s=None):
    """JAX/Pallas equivalent of MAELoss.forward."""
    B, S = y_pred.shape
    if seq_lens is None:
        seq_lens_arr = jnp.full((B,), S, dtype=jnp.int32)
    else:
        seq_lens_arr = jnp.asarray(seq_lens, dtype=jnp.int32)
    # Note: if any seq_len == 0 the per-row MAE is inf/NaN, matching the
    # PyTorch sum(mask)=0 division behavior.
    return _mae_loss_call(y_pred, y_true, seq_lens_arr, block_b, block_s)


def _mae_loss_ref(y_pred, y_true, seq_lens=None):
    """Pure-JAX reference mirroring the PyTorch code."""
    B, S = y_pred.shape
    yp = y_pred.astype(jnp.float32)
    yt = y_true.astype(jnp.float32)
    if seq_lens is None:
        mask = jnp.ones_like(yt)
    else:
        col = jnp.arange(S)[None, :]
        mask = (col < jnp.asarray(seq_lens)[:, None]).astype(jnp.float32)
    mae = jnp.sum(jnp.abs(mask * (yp - yt)), axis=1, keepdims=True) \
        / jnp.sum(mask, axis=1, keepdims=True)
    return jnp.mean(mae, axis=0)


if __name__ == "__main__":
    key = jax.random.PRNGKey(0)
    k1, k2, k3, k4, k5, k6, k7, k8 = jax.random.split(key, 8)

    # Case 1: small shapes, single (ragged) tile, masked and unmasked.
    B, S = 4, 16
    y_pred = jax.random.normal(k1, (B, S), dtype=jnp.float32)
    y_true = jax.random.normal(k2, (B, S), dtype=jnp.float32)
    seq_lens = jnp.array([16, 12, 8, 5], dtype=jnp.int32)

    out_masked = mae_loss(y_pred, y_true, seq_lens)
    jax.block_until_ready(out_masked)
    ref_masked = _mae_loss_ref(y_pred, y_true, seq_lens)

    out_full = mae_loss(y_pred, y_true, None)
    jax.block_until_ready(out_full)
    ref_full = _mae_loss_ref(y_pred, y_true, None)

    assert out_masked.shape == (1,)
    assert jnp.allclose(out_masked, ref_masked, atol=1e-5, rtol=1e-5)
    assert jnp.allclose(out_full, ref_full, atol=1e-5, rtol=1e-5)

    # Case 2: multi-tile accumulate/finalize path with forced small tiles:
    # grid = (16/8, 384/128) = (2, 3); S divisible (non-ragged static branch).
    B2, S2 = 16, 384
    yp2 = jax.random.normal(k3, (B2, S2), dtype=jnp.float32)
    yt2 = jax.random.normal(k4, (B2, S2), dtype=jnp.float32)
    lens2 = jax.random.randint(k5, (B2,), 1, S2 + 1, dtype=jnp.int32)

    out_tiled = mae_loss(yp2, yt2, lens2, block_b=8, block_s=128)
    jax.block_until_ready(out_tiled)
    ref_tiled = _mae_loss_ref(yp2, yt2, lens2)
    assert out_tiled.shape == (1,)
    assert jnp.allclose(out_tiled, ref_tiled, atol=1e-5, rtol=1e-5)

    # Case 3: ragged B and S with default tiles (no wrapper padding path,
    # in-kernel edge handling + megacore batch split: bt shrinks to 16).
    B3, S3 = 20, 300
    yp3 = jax.random.normal(k6, (B3, S3), dtype=jnp.float32)
    yt3 = jax.random.normal(k7, (B3, S3), dtype=jnp.float32)
    lens3 = jax.random.randint(k8, (B3,), 1, S3 + 1, dtype=jnp.int32)

    out_rag = mae_loss(yp3, yt3, lens3)
    jax.block_until_ready(out_rag)
    ref_rag = _mae_loss_ref(yp3, yt3, lens3)
    assert out_rag.shape == (1,)
    assert jnp.allclose(out_rag, ref_rag, atol=1e-5, rtol=1e-5)

    print("KERNEL_OK")
</pallas_src>

<mosaic_0001>
module attributes {stable_mosaic.version = 11 : i64} {
  func.func @_mae_kernel(%arg0: i32, %arg1: i32, %arg2: memref<8x128xf32, #tpu.memory_space<vmem>>, %arg3: memref<8x128xf32, #tpu.memory_space<vmem>>, %arg4: memref<8x1xi32, #tpu.memory_space<vmem>>, %arg5: memref<8x1xf32, #tpu.memory_space<vmem>>, %arg6: memref<8x128xf32, #tpu.memory_space<vmem>>) attributes {dimension_semantics = [#tpu.dimension_semantics<parallel>, #tpu.dimension_semantics<arbitrary>], iteration_bounds = array<i64: 1, 1>, scalar_prefetch = 0 : i64, scratch_operands = 1 : i64, tpu.core_type = #tpu.core_type<tc>, window_params = [{transform_indices = @transform_0, window_bounds = array<i64: 8, 128>}, {transform_indices = @transform_1, window_bounds = array<i64: 8, 128>}, {transform_indices = @transform_2, window_bounds = array<i64: 8, 1>}, {transform_indices = @transform_3, window_bounds = array<i64: 8, 1>}]} {
    %c0_i32 = arith.constant 0 : i32
    %0 = arith.cmpi eq, %arg1, %c0_i32 : i32
    %1 = arith.extui %0 : i1 to i32
    %c0_i32_0 = arith.constant 0 : i32
    %2 = arith.cmpi ne, %1, %c0_i32_0 : i32
    scf.if %2 {
      %cst_13 = arith.constant 0.000000e+00 : f32
      %29 = vector.broadcast %cst_13 : f32 to vector<8x128xf32>
      %c0_14 = arith.constant 0 : index
      %c0_15 = arith.constant 0 : index
      %30 = vector.load %arg6[%c0_14, %c0_15] : memref<8x128xf32, #tpu.memory_space<vmem>>, vector<8x128xf32>
      tpu.vector_store %arg6[%c0_14, %c0_15], %29 {strides = array<i32>} : memref<8x128xf32, #tpu.memory_space<vmem>>, vector<8x128xf32>,
    } else {
    }
    %c0 = arith.constant 0 : index
    %c0_1 = arith.constant 0 : index
    %3 = vector.load %arg2[%c0, %c0_1] : memref<8x128xf32, #tpu.memory_space<vmem>>, vector<8x128xf32>
    %c0_2 = arith.constant 0 : index
    %c0_3 = arith.constant 0 : index
    %4 = vector.load %arg3[%c0_2, %c0_3] : memref<8x128xf32, #tpu.memory_space<vmem>>, vector<8x128xf32>
    %c0_4 = arith.constant 0 : index
    %c0_5 = arith.constant 0 : index
    %5 = vector.load %arg4[%c0_4, %c0_5] : memref<8x1xi32, #tpu.memory_space<vmem>>, vector<8x1xi32>
    %6 = tpu.iota {dimensions = array<i32: 1>} : vector<8x128xi32>
    %7 = arith.subf %3, %4 : vector<8x128xf32>
    %c128_i32 = arith.constant 128 : i32
    %8 = arith.muli %arg1, %c128_i32 : i32
    %c16_i32 = arith.constant 16 : i32
    %9 = arith.subi %c16_i32, %8 : i32
    %10 = vector.broadcast %9 : i32 to vector<8x128xi32>
    %11 = arith.cmpi slt, %6, %10 : vector<8x128xi32>
    %cst = arith.constant 0.000000e+00 : f32
    %12 = vector.broadcast %cst : f32 to vector<8x128xf32>
    %13 = arith.select %11, %7, %12 : vector<8x128xi1>, vector<8x128xf32>
    %c128_i32_6 = arith.constant 128 : i32
    %14 = arith.muli %arg1, %c128_i32_6 : i32
    %15 = vector.broadcast %14 : i32 to vector<8x1xi32>
    %16 = arith.subi %5, %15 : vector<8x1xi32>
    %17 = vector.broadcast %16 : vector<8x1xi32> to vector<8x128xi32>
    %18 = arith.cmpi slt, %6, %17 : vector<8x128xi32>
    %19 = arith.extui %18 : vector<8x128xi1> to vector<8x128xi32>
    %20 = arith.sitofp %19 : vector<8x128xi32> to vector<8x128xf32>
    %21 = arith.mulf %20, %13 : vector<8x128xf32>
    %22 = math.absf %21 : vector<8x128xf32>
    %c0_7 = arith.constant 0 : index
    %c0_8 = arith.constant 0 : index
    %23 = vector.load %arg6[%c0_7, %c0_8] : memref<8x128xf32, #tpu.memory_space<vmem>>, vector<8x128xf32>
    %24 = arith.addf %23, %22 : vector<8x128xf32>
    %c0_9 = arith.constant 0 : index
    %c0_10 = arith.constant 0 : index
    %25 = vector.load %arg6[%c0_9, %c0_10] : memref<8x128xf32, #tpu.memory_space<vmem>>, vector<8x128xf32>
    tpu.vector_store %arg6[%c0_9, %c0_10], %24 {strides = array<i32>} : memref<8x128xf32, #tpu.memory_space<vmem>>, vector<8x128xf32>,
    %c0_i32_11 = arith.constant 0 : i32
    %26 = arith.cmpi eq, %arg1, %c0_i32_11 : i32
    %27 = arith.extui %26 : i1 to i32
    %c0_i32_12 = arith.constant 0 : i32
    %28 = arith.cmpi ne, %27, %c0_i32_12 : i32
    scf.if %28 {
      %c0_13 = arith.constant 0 : index
      %c0_14 = arith.constant 0 : index
      %29 = vector.load %arg6[%c0_13, %c0_14] : memref<8x128xf32, #tpu.memory_space<vmem>>, vector<8x128xf32>
      %cst_15 = arith.constant dense<0.000000e+00> : vector<8xf32>
      %30 = vector.multi_reduction <add>, %29, %cst_15 [1] : vector<8x128xf32> to vector<8xf32>
      %31 = vector.shape_cast %30 : vector<8xf32> to vector<8x1xf32>
      %c16_i32_16 = arith.constant 16 : i32
      %32 = vector.broadcast %c16_i32_16 : i32 to vector<8x1xi32>
      %33 = arith.minsi %5, %32 : vector<8x1xi32>
      %34 = arith.sitofp %33 : vector<8x1xi32> to vector<8x1xf32>
      %35 = arith.divf %31, %34 : vector<8x1xf32>
      %c0_17 = arith.constant 0 : index
      %c0_18 = arith.constant 0 : index
      %36 = vector.load %arg5[%c0_17, %c0_18] : memref<8x1xf32, #tpu.memory_space<vmem>>, vector<8x1xf32>
      tpu.vector_store %arg5[%c0_17, %c0_18], %35 {strides = array<i32>} : memref<8x1xf32, #tpu.memory_space<vmem>>, vector<8x1xf32>,
    } else {
    }
    return
  }
  func.func @transform_0(%arg0: i32, %arg1: i32) -> (i32, i32) {
    %c0_i32 = arith.constant 0 : i32
    return %arg0, %arg1 : i32, i32
  }
  func.func @transform_1(%arg0: i32, %arg1: i32) -> (i32, i32) {
    %c0_i32 = arith.constant 0 : i32
    return %arg0, %arg1 : i32, i32
  }
  func.func @transform_2(%arg0: i32, %arg1: i32) -> (i32, i32) {
    %c0_i32 = arith.constant 0 : i32
    %c0_i32_0 = arith.constant 0 : i32
    return %arg0, %c0_i32 : i32, i32
  }
  func.func @transform_3(%arg0: i32, %arg1: i32) -> (i32, i32) {
    %c0_i32 = arith.constant 0 : i32
    %c0_i32_0 = arith.constant 0 : i32
    return %arg0, %c0_i32 : i32, i32
  }
}

</mosaic_0001>

<bundles_post_ra>
// kernel: _mae_loss_call.1
= control target key start
LH: loop header
LB: loop body
LE: loop exit
PB: predicated region body
PF: predicated region fallthrough
CT: control target
= control target key end

     0   :  { %v103_v1 = vmov 0   ;;  %v22_v2 = vlaneseq  ;;  %v104_v9 = vmov 0.0   ;;  %vm54_vm3 = vcmask 7168   ;;  %s137_s0 = inlined_call_operand.vmem [shape: f32[4,16], index: 0, kind: input, shape index: {}]   ;;  %s138_s1 = inlined_call_operand.vmem [shape: f32[4,16], index: 1, kind: input, shape index: {}]   ;;  %s139_s2 = inlined_call_operand.vmem [shape: s32[8,1], index: 2, kind: input, shape index: {}]   ;;  %s140_s3 = inlined_call_operand.vmem [shape: f32[4,1], index: 3, kind: output, shape index: {}]  }
   0x1   :  { %v21_v0 = vld [vmem:[%s139_s2] sm:$0xff]  ;;  %100 = vset.pattern.permute.xlu0 %v103_v1 }
   0x2   :  { %33 = vperm.xlu0 %100, %v21_v0   ;;  %v23_v3 = vand.u32 127, %v22_v2  ;;  %v19_v4 = vld [vmem:[%s137_s0] sm:$0xff]  ;;  %vm49_vm2 = vcmp.lt.s32.totalorder %v21_v0, 16 }
   0x3   :  { %v20_v5 = vld [vmem:[%s138_s1] sm:$0xff]  ;;  %v50_v13 = vsel %vm49_vm2, %v21_v0, 16 }
   0x4   :  { %v24_v6 = vsub.f32 %v19_v4, %v20_v5  ;;  %vm28_vm0 = vcmp.lt.s32.totalorder %v23_v3, 16  ;;  %v51_v14 = vcvt.s32.f32 %v50_v13 }
   0x6   :  { %v29_v8 = vsel %vm28_vm0, %v24_v6, 0.0  ;;  %101 = vrcp.f32 %v51_v14 }
  0x13   :  { %v102_v15 = vpop.eup %101 }
  0x7d   :  { %v34_v7 = vpop.permute.xlu0 %33 }
  0x7e   :  { %vm35_vm1 = vcmp.lt.s32.totalorder %v23_v3, %v34_v7 }
  0x7f   :  { %v97_v10 = vsel %vm35_vm1, 1.0, %v104_v9 }
  0x80   :  { %v38_v11 = vmul.f32 %v97_v10, %v29_v8 }
  0x82   :  { %v39_v12 = vand.u32 2147483647, %v38_v11 }
  0x84   :  { %47 = vadd.xlane.f32.xlu0 %v39_v12 }
 0x10d   :  { %v48_v16 = vpop.xlane.xlu0 %47 }
 0x10e   :  { %v53_v17 = vmul.f32 %v102_v15, %v48_v16 }
 0x110   :  { %55 = vst.msk [vmem:[#allocation3] sm:$0xff] %vm54_vm3, %v53_v17 }
 0x117   :  { %v74_v18 = vld [vmem:[#allocation3] sm:$0xf] }
 0x118   :  { %75 = vst [vmem:[%s140_s3] sm:$0xf] %v74_v18 }

</bundles_post_ra>
